<compile_context>
chip_gen: v5e
topology: v5e:2x2
jax: 0.10.0
libtpu: 0.0.40
codegen_flags: <defaults>
</compile_context>

<pallas_src>
import jax
import jax.numpy as jnp
from jax.experimental import pallas as pl
from jax.experimental.pallas import tpu as pltpu

LANE = 128
_SUBLANE_BY_ITEMSIZE = {4: 8, 2: 16, 1: 32}


def _mish_kernel(x_ref, o_ref):
    xf = x_ref[...].astype(jnp.float32)
    # Cancellation-free rational form of tanh(softplus(x)):
    #   u = e^x*(e^x+2);  tanh(ln(1+e^x)) = u/(u+2)
    e = jnp.exp(jnp.minimum(xf, 20.0))        # clamp: no f32 overflow
    u = e * (e + 2.0)
    t = u / (u + 2.0)
    t = jnp.where(xf > 20.0, 1.0, t)          # F.softplus(threshold=20) passthrough
    o_ref[...] = (xf * t).astype(o_ref.dtype)


def _device_kind():
    try:
        return jax.devices()[0].device_kind.lower()
    except Exception:
        return ""


def mish(x, *, block_bytes=None):
    """Elementwise Mish on an arbitrary-shaped array via a Pallas TPU kernel."""
    orig_shape = x.shape
    orig_dtype = x.dtype
    n = x.size
    if n == 0:
        return x

    itemsize = jnp.dtype(orig_dtype).itemsize
    sublane = _SUBLANE_BY_ITEMSIZE.get(itemsize, 8)

    kind = _device_kind()
    is_v7 = "v7" in kind
    if block_bytes is None:
        # Pure HBM-streaming: big blocks amortize the ~0.35 us/step pipeline
        # overhead. v7x (3.2 TB/s HBM, shortest step time) gets the biggest.
        block_bytes = (8 << 20) if is_v7 else (4 << 20)

    flat = jnp.ravel(x)
    if n % LANE != 0:
        # Pad only when not lane-aligned; mish(0) = 0, tail sliced off after.
        n_pad = pl.cdiv(n, LANE) * LANE
        flat = jnp.pad(flat, (0, n_pad - n))
    else:
        n_pad = n
    rows = n_pad // LANE
    slab = flat.reshape(rows, LANE)

    # --- block sizing --------------------------------------------------------
    if rows <= sublane:
        # Block equals full array dims -> exempt from (sublane,128) divisibility.
        br = rows
    else:
        br_max = max(sublane, (block_bytes // (LANE * itemsize)) // sublane * sublane)
        num_blocks = pl.cdiv(rows, br_max)
        if is_v7 and rows >= 4 * sublane:
            # Two TensorCores: give each core >= 2 blocks, even split.
            num_blocks = max(num_blocks, 4)
            num_blocks += num_blocks % 2
        br = pl.cdiv(pl.cdiv(rows, num_blocks), sublane) * sublane
        if br >= rows:
            br = rows  # single full-array block (single-TC small-input case)
    grid = pl.cdiv(rows, br)

    block_nbytes = br * LANE * itemsize
    # Double-buffered in + out (4x block) plus headroom; capped at 40 MiB so it
    # stays well inside v7x's 64 MiB physical VMEM (128 MiB on v5e/v6e).
    vmem_limit = int(min(40 << 20, max(32 << 20, 4 * block_nbytes + (8 << 20))))

    cost = pl.CostEstimate(
        flops=6 * n_pad,
        transcendentals=n_pad,               # one exp per element
        bytes_accessed=2 * n_pad * itemsize,
    )

    out = pl.pallas_call(
        _mish_kernel,
        out_shape=jax.ShapeDtypeStruct((rows, LANE), orig_dtype),
        grid_spec=pltpu.PrefetchScalarGridSpec(
            num_scalar_prefetch=0,
            grid=(grid,),
            in_specs=[pl.BlockSpec((br, LANE), lambda i: (i, 0))],
            out_specs=pl.BlockSpec((br, LANE), lambda i: (i, 0)),
        ),
        compiler_params=pltpu.CompilerParams(
            dimension_semantics=("parallel",),
            vmem_limit_bytes=vmem_limit,
        ),
        cost_estimate=cost,
    )(slab)

    if n_pad == n:
        return out.reshape(orig_shape)
    return out.reshape(-1)[:n].reshape(orig_shape)


def mish_reference(x):
    # Mirrors PyTorch: x * tanh(F.softplus(x)) with softplus threshold=20.
    xf = x.astype(jnp.float32)
    sp = jnp.where(xf > 20.0, xf, jnp.log1p(jnp.exp(jnp.minimum(xf, 20.0))))
    return (xf * jnp.tanh(sp)).astype(x.dtype)


if __name__ == "__main__":
    key = jax.random.PRNGKey(0)

    # Main case: NCHW (2, 4, 16, 16) f32 — lane-aligned zero-copy path.
    x = jax.random.normal(key, (2, 4, 16, 16), dtype=jnp.float32) * 3.0
    y = jax.block_until_ready(mish(x))
    y_ref = mish_reference(x)
    assert y.shape == x.shape and y.dtype == x.dtype
    assert jnp.allclose(y, y_ref, atol=1e-5, rtol=1e-5)

    # Unaligned case exercising the padded path (945 elements, not % 128).
    x2 = jax.random.normal(jax.random.PRNGKey(1), (3, 5, 7, 9), dtype=jnp.float32) * 5.0
    y2 = jax.block_until_ready(mish(x2))
    assert y2.shape == x2.shape
    assert jnp.allclose(y2, mish_reference(x2), atol=1e-5, rtol=1e-5)

    # bf16 case exercising the dtype-aware (16, 128) sublane tiling.
    x3 = (jax.random.normal(jax.random.PRNGKey(2), (2, 4, 16, 16), dtype=jnp.float32) * 3.0
          ).astype(jnp.bfloat16)
    y3 = jax.block_until_ready(mish(x3))
    assert y3.shape == x3.shape and y3.dtype == x3.dtype
    assert jnp.allclose(y3.astype(jnp.float32),
                        mish_reference(x3).astype(jnp.float32),
                        atol=1e-2, rtol=1e-2)

    print("KERNEL_OK")
</pallas_src>

<mosaic_0001>
module attributes {stable_mosaic.version = 11 : i64} {
  func.func @_mish_kernel(%arg0: i32, %arg1: memref<16x128xf32, #tpu.memory_space<vmem>>, %arg2: memref<16x128xf32, #tpu.memory_space<vmem>>) attributes {dimension_semantics = [#tpu.dimension_semantics<parallel>], iteration_bounds = array<i64: 1>, scalar_prefetch = 0 : i64, scratch_operands = 0 : i64, tpu.core_type = #tpu.core_type<tc>, window_params = [{transform_indices = @transform_0, window_bounds = array<i64: 16, 128>}, {transform_indices = @transform_1, window_bounds = array<i64: 16, 128>}]} {
    %c0 = arith.constant 0 : index
    %c0_0 = arith.constant 0 : index
    %0 = vector.load %arg1[%c0, %c0_0] : memref<16x128xf32, #tpu.memory_space<vmem>>, vector<16x128xf32>
    %cst = arith.constant 2.000000e+01 : f32
    %1 = vector.broadcast %cst : f32 to vector<16x128xf32>
    %2 = arith.minimumf %0, %1 : vector<16x128xf32>
    %3 = math.exp %2 : vector<16x128xf32>
    %cst_1 = arith.constant 2.000000e+00 : f32
    %4 = vector.broadcast %cst_1 : f32 to vector<16x128xf32>
    %5 = arith.addf %3, %4 : vector<16x128xf32>
    %6 = arith.mulf %3, %5 : vector<16x128xf32>
    %cst_2 = arith.constant 2.000000e+00 : f32
    %7 = vector.broadcast %cst_2 : f32 to vector<16x128xf32>
    %8 = arith.addf %6, %7 : vector<16x128xf32>
    %9 = arith.divf %6, %8 : vector<16x128xf32>
    %cst_3 = arith.constant 2.000000e+01 : f32
    %10 = vector.broadcast %cst_3 : f32 to vector<16x128xf32>
    %11 = arith.cmpf ogt, %0, %10 : vector<16x128xf32>
    %cst_4 = arith.constant 1.000000e+00 : f32
    %12 = vector.broadcast %cst_4 : f32 to vector<16x128xf32>
    %13 = arith.select %11, %12, %9 : vector<16x128xi1>, vector<16x128xf32>
    %14 = arith.mulf %0, %13 : vector<16x128xf32>
    %c0_5 = arith.constant 0 : index
    %c0_6 = arith.constant 0 : index
    %15 = vector.load %arg2[%c0_5, %c0_6] : memref<16x128xf32, #tpu.memory_space<vmem>>, vector<16x128xf32>
    tpu.vector_store %arg2[%c0_5, %c0_6], %14 {strides = array<i32>} : memref<16x128xf32, #tpu.memory_space<vmem>>, vector<16x128xf32>,
    return
  }
  func.func @transform_0(%arg0: i32) -> (i32, i32) {
    %c0_i32 = arith.constant 0 : i32
    %c0_i32_0 = arith.constant 0 : i32
    return %arg0, %c0_i32 : i32, i32
  }
  func.func @transform_1(%arg0: i32) -> (i32, i32) {
    %c0_i32 = arith.constant 0 : i32
    %c0_i32_0 = arith.constant 0 : i32
    return %arg0, %c0_i32 : i32, i32
  }
}

</mosaic_0001>

<bundles_post_ra>
// kernel: tpu_custom_call.1
= control target key start
LH: loop header
LB: loop body
LE: loop exit
PB: predicated region body
PF: predicated region fallthrough
CT: control target
= control target key end

     0   :  { %6 = vsyncpa [#allocation3], 0  ;;  %s186_s0 = inlined_call_operand.hbm [shape: f32[16,128], index: 0, kind: input, shape index: {}]   ;;  %s187_s1 = inlined_call_operand.hbm [shape: f32[16,128], index: 1, kind: output, shape index: {}]  }
   0x1   :  { %7 = vsyncpa [#allocation4], 0  ;;  %s12_s8 = sshll.u32 %s186_s0, 4  ;;  %s160_s9 = smov [#allocation2]   ;;  %s13_s8 = int_to_ptr.hbm [resolvable:$true] %s12_s8 }
   0x2   :  { %s14_s10 = sshll.u32 %s160_s9, 4  ;;  %s161_s11 = smov 128   ;;  %s15_s10 = int_to_ptr.vmem [resolvable:$true] %s14_s10 }
   0x3   :  { %s162_s12 = smov 8  }
   0x4   :  { %20 = dma.hbm_to_vmem [thread:$0]  %s13_s8, 256, %s15_s10, [#allocation3], %s161_s11, %s161_s11, %s162_s12  }
   0x5   :  { %156 = dma.done.wait [#allocation3], 256  }
   0x6   :  { %157 = vsyncadd [#allocation3], 4294967040  ;;  %v25_v0 = vld [vmem:[#allocation2] sm:$0xff]  ;;  %v26_v1 = vld [vmem:[#allocation2 + $0x8] sm:$0xff]  ;;  %s163_s0 = smov [#allocation5]   ;;  %s83_s16 = sshll.u32 %s187_s1, 4  ;;  %s84_s16 = int_to_ptr.hbm [resolvable:$true] %s83_s16 }
   0x7   :  { %v27_v2 = vmin.f32 %v25_v0, 20.0  ;;  %v28_v3 = vmin.f32 %v26_v1, 20.0  ;;  %vm69_vm8 = vcmp.gt.f32.partialorder %v25_v0, 20.0  ;;  %vm70_vm9 = vcmp.gt.f32.partialorder %v26_v1, 20.0  ;;  %s81_s13 = sshll.u32 %s163_s0, 4  ;;  %s82_s13 = int_to_ptr.vmem [resolvable:$true] %s81_s13 }
   0x9   :  { %v29_v4 = vmul.f32 1.442695, %v27_v2  ;;  %v31_v5 = vmul.f32 1.442695, %v28_v3 }
   0xb   :  { %100 = vpow2.f32 %v29_v4 }
   0xc   :  { %102 = vpow2.f32 %v31_v5 }
  0x11   :  { %v101_v6 = vpop.eup %100 }
  0x12   :  { %v103_v7 = vpop.eup %102  ;;  %v33_v8 = vadd.f32 2.0, %v101_v6 }
  0x13   :  { %v34_v9 = vadd.f32 2.0, %v103_v7 }
  0x14   :  { %v35_v10 = vmul.f32 %v101_v6, %v33_v8 }
  0x15   :  { %v36_v11 = vmul.f32 %v103_v7, %v34_v9 }
  0x16   :  { %v37_v12 = vadd.f32 2.0, %v35_v10 }
  0x17   :  { %v38_v13 = vadd.f32 2.0, %v36_v11 }
  0x18   :  { %104 = vrcp.f32 %v37_v12  ;;  %vm44_vm0 = vweird.f32 %v37_v12  ;;  %v50_v17 = vand.u32 2147483648, %v37_v12  ;;  %v48_v20 = vand.u32 2147483647, %v37_v12 }
  0x19   :  { %106 = vrcp.f32 %v38_v13  ;;  %v65_v21 = vand.u32 2147483648, %v38_v13  ;;  %vm59_vm2 = vweird.f32 %v38_v13  ;;  %v63_v23 = vand.u32 2147483647, %v38_v13 }
  0x1a   :  { %v51_v25 = vor.u32 1.1754944e-38, %v50_v17  ;;  %vm49_vm5 = vcmp.eq.f32.partialorder %v48_v20, 8.507059e+37 }
  0x1b   :  { %v66_v28 = vor.u32 1.1754944e-38, %v65_v21  ;;  %vm64_vm7 = vcmp.eq.f32.partialorder %v63_v23, 8.507059e+37 }
  0x1e   :  { %v105_v14 = vpop.eup %104 }
  0x1f   :  { %v107_v15 = vpop.eup %106  ;;  %v40_v16 = vmul.f32 %v105_v14, %v37_v12  ;;  %vm45_vm1 = vweird.f32 %v105_v14 }
  0x20   :  { %v55_v18 = vmul.f32 %v107_v15, %v38_v13  ;;  %vm60_vm3 = vweird.f32 %v107_v15  ;;  %vm46_vm4 = vmor %vm44_vm0, %vm45_vm1 }
  0x21   :  { %v41_v19 = vsub.f32 1.0, %v40_v16  ;;  %vm61_vm6 = vmor %vm59_vm2, %vm60_vm3 }
  0x22   :  { %v56_v22 = vsub.f32 1.0, %v55_v18 }
  0x23   :  { %v42_v24 = vmul.f32 %v105_v14, %v41_v19 }
  0x24   :  { %v57_v26 = vmul.f32 %v107_v15, %v56_v22 }
  0x25   :  { %v43_v27 = vadd.f32 %v105_v14, %v42_v24 }
  0x26   :  { %v58_v29 = vadd.f32 %v107_v15, %v57_v26 }
  0x27   :  { %v47_v30 = vsel %vm46_vm4, %v105_v14, %v43_v27 }
  0x28   :  { %v52_v31 = vsel %vm49_vm5, %v51_v25, %v47_v30  ;;  %v62_v32 = vsel %vm61_vm6, %v107_v15, %v58_v29 }
  0x29   :  { %v53_v33 = vmul.f32 %v52_v31, %v35_v10  ;;  %v67_v34 = vsel %vm64_vm7, %v66_v28, %v62_v32 }
  0x2a   :  { %v68_v35 = vmul.f32 %v67_v34, %v36_v11 }
  0x2b   :  { %v71_v36 = vsel %vm69_vm8, 1.0, %v53_v33 }
  0x2c   :  { %v73_v37 = vmul.f32 %v71_v36, %v25_v0  ;;  %v72_v38 = vsel %vm70_vm9, 1.0, %v68_v35 }
  0x2d   :  { %v74_v39 = vmul.f32 %v72_v38, %v26_v1 }
  0x2e   :  { %75 = vst [vmem:[#allocation5] sm:$0xff] %v73_v37 }
  0x2f   :  { %76 = vst [vmem:[#allocation5 + $0x8] sm:$0xff] %v74_v39 }
  0x30   :  { %89 = dma.vmem_to_hbm [thread:$0]  %s82_s13, 256, %s84_s16, [#allocation4], %s161_s11, %s161_s11, %s162_s12  }
  0x31   :  { %158 = dma.done.wait [#allocation4], 256  }
  0x32   :  { %159 = vsyncadd [#allocation4], 4294967040 }
  0x33   :  { %94 = vsyncpa [#allocation3], 1 }
  0x34   :  { %95 = vsyncpa [#allocation4], 1 }

</bundles_post_ra>
